<compile_context>
chip_gen: v7x
topology: tpu7x:2x2x1
jax: 0.10.0
libtpu: 0.0.40
codegen_flags: <defaults>
</compile_context>

<pallas_src>
import jax
import jax.numpy as jnp
from jax import lax
from jax.experimental import pallas as pl
from jax.experimental.pallas import tpu as pltpu


def _softplus(x):
    # Numerically stable softplus: max(x, 0) + log1p(exp(-|x|))
    return jnp.maximum(x, 0.0) + jnp.log1p(jnp.exp(-jnp.abs(x)))


def postnet_kernel(z0_ref, hx_ref, eps_ref,
                   w1_ref, b1_ref, w2_ref, b2_ref,
                   z_out_ref, mu_out_ref, lv_out_ref,
                   z_carry):
    c = pl.program_id(1)                   # time-chunk index (innermost, sequential)

    # Chunk 0 of each batch block starts from z0; later chunks continue from
    # the carry written by the previous chunk (chunk axis iterates innermost).
    @pl.when(c == 0)
    def _():
        z_carry[...] = z0_ref[...].astype(jnp.float32)

    tc = hx_ref.shape[0]                   # static chunk length
    z_dim = eps_ref.shape[-1]

    # VMEM-resident weights, loaded once per grid step.
    w1 = w1_ref[...]                       # (z_dim, h_dim)
    b1 = b1_ref[...]                       # (1, h_dim)
    w2 = w2_ref[...]                       # (h_dim, 2*z_dim), 0.5 pre-folded
    b2 = b2_ref[...]                       # (1, 2*z_dim)

    def step(t, z):
        hx = hx_ref[t]                     # (TB, h_dim) f32
        eps = eps_ref[t]                   # (TB, z_dim) f32

        # Stage 1: h = tanh(z @ W1 + b1)   (MXU matmul, EUP tanh)
        h = jnp.tanh(
            jnp.dot(z.astype(w1.dtype), w1, preferred_element_type=jnp.float32)
            + b1)
        h_sum = h + hx                     # 0.5 folded into w2

        # Stage 2 (fused): [mu | logvar] = (h+hx) @ (0.5*[Wmu|Wlv]) + [bmu|blv]
        mulv = (jnp.dot(h_sum.astype(w2.dtype), w2,
                        preferred_element_type=jnp.float32)
                + b2)
        mu = mulv[:, :z_dim]
        logvar = mulv[:, z_dim:]

        std = _softplus(logvar)
        z_t = eps * std + mu

        z_out_ref[t] = z_t.astype(z_out_ref.dtype)
        mu_out_ref[t] = mu.astype(mu_out_ref.dtype)
        lv_out_ref[t] = logvar.astype(lv_out_ref.dtype)
        return z_t                         # recurrence carried in vregs

    z_final = lax.fori_loop(0, tc, step, z_carry[...], unroll=True)
    z_carry[...] = z_final                 # one scratch write per chunk


def _largest_divisor_le(n, target):
    target = max(1, min(int(target), int(n)))
    for c in range(target, 0, -1):
        if n % c == 0:
            return c
    return 1


def postnet_rollout(z0, h_x_seq, eps_seq, params, *,
                    matmul_dtype=jnp.float32, time_chunk=32, batch_block=None):
    """Run T consecutive PostNet steps inside one pallas_call.

    z0: (B, z_dim); h_x_seq: (T, B, h_dim); eps_seq: (T, B, z_dim).
    Returns (z_t, mu, logvar), each (T, B, z_dim).
    """
    T, B, h_dim = h_x_seq.shape
    z_dim = z0.shape[-1]
    w1, b1, wmu, bmu, wlv, blv = params

    tc = _largest_divisor_le(T, time_chunk)          # time-chunk length
    tb = B if batch_block is None else int(batch_block)
    assert B % tb == 0 and (tb == B or tb % 8 == 0), \
        "batch_block must divide B and be a multiple of 8 (or equal B)"
    nb, nc = B // tb, T // tc

    mdt = jnp.dtype(matmul_dtype)
    w1p = w1.astype(mdt)                                            # (z_dim, h_dim)
    # 0.5 from h_combined folded into the fused stage-2 weights (biases NOT scaled).
    w2p = (0.5 * jnp.concatenate([wmu, wlv], axis=1)).astype(mdt)   # (h_dim, 2*z_dim)
    b1p = b1.reshape(1, h_dim).astype(jnp.float32)
    b2p = jnp.concatenate([bmu, blv]).reshape(1, 2 * z_dim).astype(jnp.float32)

    def resident(shape):
        # VMEM-resident across the whole grid (constant index_map -> no re-DMA).
        return pl.BlockSpec(shape, lambda b, c: tuple(0 for _ in shape))

    flops = 2 * T * B * (z_dim * h_dim + h_dim * 2 * z_dim)
    transcendentals = T * B * (h_dim + 2 * z_dim)                   # tanh + softplus
    bytes_accessed = (
        z0.size * 4 + h_x_seq.size * 4 + eps_seq.size * 4
        + (w1p.size + w2p.size) * mdt.itemsize
        + (b1p.size + b2p.size) * 4
        + 3 * T * B * z_dim * 4
    )

    out_sds = jax.ShapeDtypeStruct((T, B, z_dim), jnp.float32)
    seq_spec_h = pl.BlockSpec((tc, tb, h_dim), lambda b, c: (c, b, 0))
    seq_spec_z = pl.BlockSpec((tc, tb, z_dim), lambda b, c: (c, b, 0))

    z_seq, mu_seq, lv_seq = pl.pallas_call(
        postnet_kernel,
        out_shape=(out_sds, out_sds, out_sds),
        grid=(nb, nc),
        in_specs=[
            pl.BlockSpec((tb, z_dim), lambda b, c: (b, 0)),   # z0 (per batch block)
            seq_spec_h,                                       # h_x chunk
            seq_spec_z,                                       # eps chunk
            resident((z_dim, h_dim)),                         # W1
            resident((1, h_dim)),                             # b1
            resident((h_dim, 2 * z_dim)),                     # 0.5*[Wmu | Wlv]
            resident((1, 2 * z_dim)),                         # [bmu | blv]
        ],
        out_specs=(seq_spec_z, seq_spec_z, seq_spec_z),       # z, mu, logvar (unpacked)
        scratch_shapes=[pltpu.VMEM((tb, z_dim), jnp.float32)],  # z carry across chunks
        compiler_params=pltpu.CompilerParams(
            dimension_semantics=("parallel", "arbitrary")),   # batch || , time sequential
        cost_estimate=pl.CostEstimate(
            flops=flops,
            transcendentals=transcendentals,
            bytes_accessed=bytes_accessed),
    )(z0, h_x_seq, eps_seq, w1p, b1p, w2p, b2p)

    return z_seq, mu_seq, lv_seq


def postnet_forward(z_t_1, h_x, epsilon, params, *, matmul_dtype=jnp.float32):
    """Single step — matches PostNet.forward(z_t_1, h_x) with epsilon supplied."""
    z_t, mu, logvar = postnet_rollout(
        z_t_1, h_x[None], epsilon[None], params, matmul_dtype=matmul_dtype)
    return z_t[0], mu[0], logvar[0]


def init_params(key, z_dim, h_dim, dtype=jnp.float32):
    """Deterministic synthetic parameters (uniform, PyTorch-Linear-like bounds)."""
    ks = jax.random.split(key, 6)

    def u(k, shape, fan_in):
        bound = 1.0 / jnp.sqrt(fan_in)
        return jax.random.uniform(k, shape, dtype, -bound, bound)

    w1 = u(ks[0], (z_dim, h_dim), z_dim)    # [in, out]
    b1 = u(ks[1], (h_dim,), z_dim)
    wmu = u(ks[2], (h_dim, z_dim), h_dim)
    bmu = u(ks[3], (z_dim,), h_dim)
    wlv = u(ks[4], (h_dim, z_dim), h_dim)
    blv = u(ks[5], (z_dim,), h_dim)
    return (w1, b1, wmu, bmu, wlv, blv)


def postnet_reference_step(z, h_x, eps, params):
    w1, b1, wmu, bmu, wlv, blv = params
    h_combined = 0.5 * (jnp.tanh(z @ w1 + b1) + h_x)
    mu = h_combined @ wmu + bmu
    logvar = h_combined @ wlv + blv
    std = jax.nn.softplus(logvar)
    return eps * std + mu, mu, logvar


def postnet_reference_rollout(z0, hx_seq, eps_seq, params):
    def step(z, inp):
        hx, eps = inp
        z_t, mu, lv = postnet_reference_step(z, hx, eps, params)
        return z_t, (z_t, mu, lv)

    _, (zs, mus, lvs) = jax.lax.scan(step, z0, (hx_seq, eps_seq))
    return zs, mus, lvs


if __name__ == "__main__":
    B, z_dim, h_dim, T = 8, 16, 32, 6

    key = jax.random.PRNGKey(0)
    k_params, k_z, k_h, k_eps = jax.random.split(key, 4)

    params = init_params(k_params, z_dim, h_dim)
    z0 = jax.random.normal(k_z, (B, z_dim), jnp.float32)
    h_x_seq = jax.random.normal(k_h, (T, B, h_dim), jnp.float32)
    # torch.randn epsilon is generated as glue in plain JAX and fed to the
    # kernel so results stay deterministic / comparable to the reference.
    # TODO(synk): optional in-kernel pltpu.prng_seed + stateful_normal epsilon
    # (changes the RNG stream vs torch.randn, so kept out of the default path).
    eps_seq = jax.random.normal(k_eps, (T, B, z_dim), jnp.float32)

    # --- single step (exactly PostNet.forward semantics) ---
    z_t, mu, lv = postnet_forward(z0, h_x_seq[0], eps_seq[0], params)
    jax.block_until_ready((z_t, mu, lv))
    z_r, mu_r, lv_r = postnet_reference_step(z0, h_x_seq[0], eps_seq[0], params)
    assert jnp.allclose(z_t, z_r, atol=1e-5, rtol=1e-5)
    assert jnp.allclose(mu, mu_r, atol=1e-5, rtol=1e-5)
    assert jnp.allclose(lv, lv_r, atol=1e-5, rtol=1e-5)

    # --- in-kernel recurrent time loop, single chunk (f32 matmuls) ---
    zs, mus, lvs = postnet_rollout(z0, h_x_seq, eps_seq, params)
    jax.block_until_ready((zs, mus, lvs))
    zs_r, mus_r, lvs_r = postnet_reference_rollout(z0, h_x_seq, eps_seq, params)
    assert jnp.allclose(zs, zs_r, atol=1e-4, rtol=1e-4)
    assert jnp.allclose(mus, mus_r, atol=1e-4, rtol=1e-4)
    assert jnp.allclose(lvs, lvs_r, atol=1e-4, rtol=1e-4)

    # --- multi-chunk rollout: exercises the z carry across time chunks ---
    T2 = 12
    k_h2, k_e2 = jax.random.split(jax.random.PRNGKey(1))
    h_x2 = jax.random.normal(k_h2, (T2, B, h_dim), jnp.float32)
    eps2 = jax.random.normal(k_e2, (T2, B, z_dim), jnp.float32)
    zs2, mus2, lvs2 = postnet_rollout(z0, h_x2, eps2, params, time_chunk=4)
    jax.block_until_ready((zs2, mus2, lvs2))
    zs2_r, mus2_r, lvs2_r = postnet_reference_rollout(z0, h_x2, eps2, params)
    assert jnp.allclose(zs2, zs2_r, atol=1e-4, rtol=1e-4)
    assert jnp.allclose(mus2, mus2_r, atol=1e-4, rtol=1e-4)
    assert jnp.allclose(lvs2, lvs2_r, atol=1e-4, rtol=1e-4)

    # --- optional bf16 MXU operands, f32 accumulate + f32 elementwise tail ---
    zs_bf, mus_bf, lvs_bf = postnet_rollout(
        z0, h_x_seq, eps_seq, params, matmul_dtype=jnp.bfloat16)
    jax.block_until_ready((zs_bf, mus_bf, lvs_bf))
    assert jnp.allclose(zs_bf, zs_r, atol=5e-2, rtol=5e-2)
    assert jnp.allclose(mus_bf, mus_r, atol=5e-2, rtol=5e-2)
    assert jnp.allclose(lvs_bf, lvs_r, atol=5e-2, rtol=5e-2)

    print("KERNEL_OK")
</pallas_src>

<mosaic_0001>
module attributes {stable_mosaic.version = 11 : i64} {
  func.func @postnet_kernel(%arg0: i32, %arg1: i32, %arg2: memref<8x16xf32, #tpu.memory_space<vmem>>, %arg3: memref<1x8x32xf32, #tpu.memory_space<vmem>>, %arg4: memref<1x8x16xf32, #tpu.memory_space<vmem>>, %arg5: memref<16x32xf32, #tpu.memory_space<vmem>>, %arg6: memref<1x32xf32, #tpu.memory_space<vmem>>, %arg7: memref<32x32xf32, #tpu.memory_space<vmem>>, %arg8: memref<1x32xf32, #tpu.memory_space<vmem>>, %arg9: memref<1x8x16xf32, #tpu.memory_space<vmem>>, %arg10: memref<1x8x16xf32, #tpu.memory_space<vmem>>, %arg11: memref<1x8x16xf32, #tpu.memory_space<vmem>>, %arg12: memref<8x16xf32, #tpu.memory_space<vmem>>) attributes {dimension_semantics = [#tpu.dimension_semantics<parallel>, #tpu.dimension_semantics<arbitrary>], iteration_bounds = array<i64: 1, 1>, scalar_prefetch = 0 : i64, scratch_operands = 1 : i64, tpu.core_type = #tpu.core_type<tc>, window_params = [{transform_indices = @transform_0, window_bounds = array<i64: 8, 16>}, {transform_indices = @transform_1, window_bounds = array<i64: 1, 8, 32>}, {transform_indices = @transform_2, window_bounds = array<i64: 1, 8, 16>}, {pipeline_mode = #tpu.pipeline_mode<synchronous>, transform_indices = @transform_3, window_bounds = array<i64: 16, 32>}, {pipeline_mode = #tpu.pipeline_mode<synchronous>, transform_indices = @transform_4, window_bounds = array<i64: 1, 32>}, {pipeline_mode = #tpu.pipeline_mode<synchronous>, transform_indices = @transform_5, window_bounds = array<i64: 32, 32>}, {pipeline_mode = #tpu.pipeline_mode<synchronous>, transform_indices = @transform_6, window_bounds = array<i64: 1, 32>}, {transform_indices = @transform_7, window_bounds = array<i64: 1, 8, 16>}, {transform_indices = @transform_8, window_bounds = array<i64: 1, 8, 16>}, {transform_indices = @transform_9, window_bounds = array<i64: 1, 8, 16>}]} {
    %c0_i32 = arith.constant 0 : i32
    %0 = arith.cmpi eq, %arg1, %c0_i32 : i32
    %1 = arith.extui %0 : i1 to i32
    %c0_i32_0 = arith.constant 0 : i32
    %2 = arith.cmpi ne, %1, %c0_i32_0 : i32
    scf.if %2 {
      %c0_26 = arith.constant 0 : index
      %c0_27 = arith.constant 0 : index
      %47 = vector.load %arg2[%c0_26, %c0_27] : memref<8x16xf32, #tpu.memory_space<vmem>>, vector<8x16xf32>
      %c0_28 = arith.constant 0 : index
      %c0_29 = arith.constant 0 : index
      %48 = vector.load %arg12[%c0_28, %c0_29] : memref<8x16xf32, #tpu.memory_space<vmem>>, vector<8x16xf32>
      tpu.vector_store %arg12[%c0_28, %c0_29], %47 {strides = array<i32>} : memref<8x16xf32, #tpu.memory_space<vmem>>, vector<8x16xf32>,
    } else {
    }
    %c0 = arith.constant 0 : index
    %c0_1 = arith.constant 0 : index
    %3 = vector.load %arg5[%c0, %c0_1] : memref<16x32xf32, #tpu.memory_space<vmem>>, vector<16x32xf32>
    %c0_2 = arith.constant 0 : index
    %c0_3 = arith.constant 0 : index
    %4 = vector.load %arg6[%c0_2, %c0_3] : memref<1x32xf32, #tpu.memory_space<vmem>>, vector<1x32xf32>
    %c0_4 = arith.constant 0 : index
    %c0_5 = arith.constant 0 : index
    %5 = vector.load %arg7[%c0_4, %c0_5] : memref<32x32xf32, #tpu.memory_space<vmem>>, vector<32x32xf32>
    %c0_6 = arith.constant 0 : index
    %c0_7 = arith.constant 0 : index
    %6 = vector.load %arg8[%c0_6, %c0_7] : memref<1x32xf32, #tpu.memory_space<vmem>>, vector<1x32xf32>
    %c0_8 = arith.constant 0 : index
    %c0_9 = arith.constant 0 : index
    %7 = vector.load %arg12[%c0_8, %c0_9] : memref<8x16xf32, #tpu.memory_space<vmem>>, vector<8x16xf32>
    %c0_i32_10 = arith.constant 0 : i32
    %8 = arith.index_cast %c0_i32_10 : i32 to index
    %c0_11 = arith.constant 0 : index
    %c0_12 = arith.constant 0 : index
    %9 = vector.load %arg3[%8, %c0_11, %c0_12] : memref<1x8x32xf32, #tpu.memory_space<vmem>>, vector<1x8x32xf32>
    %10 = vector.shape_cast %9 : vector<1x8x32xf32> to vector<8x32xf32>
    %11 = arith.index_cast %c0_i32_10 : i32 to index
    %c0_13 = arith.constant 0 : index
    %c0_14 = arith.constant 0 : index
    %12 = vector.load %arg4[%11, %c0_13, %c0_14] : memref<1x8x16xf32, #tpu.memory_space<vmem>>, vector<1x8x16xf32>
    %13 = vector.shape_cast %12 : vector<1x8x16xf32> to vector<8x16xf32>
    %cst = arith.constant dense<0.000000e+00> : vector<8x32xf32>
    %14 = tpu.matmul %7, %3, %cst {dimension_numbers = #tpu.dot_dimension_numbers<[1], [0], [0], [1], [0, 0, 1, 1], [], []>} : vector<8x16xf32>, vector<16x32xf32>, vector<8x32xf32> -> vector<8x32xf32>
    %15 = vector.broadcast %4 : vector<1x32xf32> to vector<8x32xf32>
    %16 = arith.addf %14, %15 : vector<8x32xf32>
    %17 = math.tanh %16 : vector<8x32xf32>
    %18 = arith.addf %17, %10 : vector<8x32xf32>
    %cst_15 = arith.constant dense<0.000000e+00> : vector<8x32xf32>
    %19 = tpu.matmul %18, %5, %cst_15 {dimension_numbers = #tpu.dot_dimension_numbers<[1], [0], [0], [1], [0, 0, 1, 1], [], []>} : vector<8x32xf32>, vector<32x32xf32>, vector<8x32xf32> -> vector<8x32xf32>
    %20 = vector.broadcast %6 : vector<1x32xf32> to vector<8x32xf32>
    %21 = arith.addf %19, %20 : vector<8x32xf32>
    %22 = vector.extract_strided_slice %21 {offsets = [0, 0], sizes = [8, 16], strides = [1, 1]} : vector<8x32xf32> to vector<8x16xf32>
    %23 = vector.extract_strided_slice %21 {offsets = [0, 16], sizes = [8, 16], strides = [1, 1]} : vector<8x32xf32> to vector<8x16xf32>
    %cst_16 = arith.constant 0.000000e+00 : f32
    %24 = vector.broadcast %cst_16 : f32 to vector<8x16xf32>
    %25 = arith.maximumf %23, %24 : vector<8x16xf32>
    %26 = math.absf %23 : vector<8x16xf32>
    %cst_17 = arith.constant 0.000000e+00 : f32
    %27 = vector.broadcast %cst_17 : f32 to vector<8x16xf32>
    %28 = arith.subf %27, %26 : vector<8x16xf32>
    %29 = math.exp %28 : vector<8x16xf32>
    %30 = math.log1p %29 : vector<8x16xf32>
    %31 = arith.addf %25, %30 : vector<8x16xf32>
    %32 = arith.mulf %13, %31 : vector<8x16xf32>
    %33 = arith.addf %32, %22 : vector<8x16xf32>
    %34 = arith.index_cast %c0_i32_10 : i32 to index
    %c0_18 = arith.constant 0 : index
    %c0_19 = arith.constant 0 : index
    %35 = vector.load %arg9[%34, %c0_18, %c0_19] : memref<1x8x16xf32, #tpu.memory_space<vmem>>, vector<1x8x16xf32>
    %36 = vector.shape_cast %35 : vector<1x8x16xf32> to vector<8x16xf32>
    %37 = vector.shape_cast %33 : vector<8x16xf32> to vector<1x8x16xf32>
    tpu.vector_store %arg9[%34, %c0_18, %c0_19], %37 {strides = array<i32>} : memref<1x8x16xf32, #tpu.memory_space<vmem>>, vector<1x8x16xf32>,
    %38 = arith.index_cast %c0_i32_10 : i32 to index
    %c0_20 = arith.constant 0 : index
    %c0_21 = arith.constant 0 : index
    %39 = vector.load %arg10[%38, %c0_20, %c0_21] : memref<1x8x16xf32, #tpu.memory_space<vmem>>, vector<1x8x16xf32>
    %40 = vector.shape_cast %39 : vector<1x8x16xf32> to vector<8x16xf32>
    %41 = vector.shape_cast %22 : vector<8x16xf32> to vector<1x8x16xf32>
    tpu.vector_store %arg10[%38, %c0_20, %c0_21], %41 {strides = array<i32>} : memref<1x8x16xf32, #tpu.memory_space<vmem>>, vector<1x8x16xf32>,
    %42 = arith.index_cast %c0_i32_10 : i32 to index
    %c0_22 = arith.constant 0 : index
    %c0_23 = arith.constant 0 : index
    %43 = vector.load %arg11[%42, %c0_22, %c0_23] : memref<1x8x16xf32, #tpu.memory_space<vmem>>, vector<1x8x16xf32>
    %44 = vector.shape_cast %43 : vector<1x8x16xf32> to vector<8x16xf32>
    %45 = vector.shape_cast %23 : vector<8x16xf32> to vector<1x8x16xf32>
    tpu.vector_store %arg11[%42, %c0_22, %c0_23], %45 {strides = array<i32>} : memref<1x8x16xf32, #tpu.memory_space<vmem>>, vector<1x8x16xf32>,
    %c1_i32 = arith.constant 1 : i32
    %c0_24 = arith.constant 0 : index
    %c0_25 = arith.constant 0 : index
    %46 = vector.load %arg12[%c0_24, %c0_25] : memref<8x16xf32, #tpu.memory_space<vmem>>, vector<8x16xf32>
    tpu.vector_store %arg12[%c0_24, %c0_25], %33 {strides = array<i32>} : memref<8x16xf32, #tpu.memory_space<vmem>>, vector<8x16xf32>,
    return
  }
  func.func @transform_0(%arg0: i32, %arg1: i32) -> (i32, i32) {
    %c0_i32 = arith.constant 0 : i32
    %c0_i32_0 = arith.constant 0 : i32
    return %arg0, %c0_i32 : i32, i32
  }
  func.func @transform_1(%arg0: i32, %arg1: i32) -> (i32, i32, i32) {
    %c0_i32 = arith.constant 0 : i32
    %c0_i32_0 = arith.constant 0 : i32
    return %arg1, %arg0, %c0_i32 : i32, i32, i32
  }
  func.func @transform_2(%arg0: i32, %arg1: i32) -> (i32, i32, i32) {
    %c0_i32 = arith.constant 0 : i32
    %c0_i32_0 = arith.constant 0 : i32
    return %arg1, %arg0, %c0_i32 : i32, i32, i32
  }
  func.func @transform_3(%arg0: i32, %arg1: i32) -> (i32, i32) {
    %c0_i32 = arith.constant 0 : i32
    %c0_i32_0 = arith.constant 0 : i32
    %c0_i32_1 = arith.constant 0 : i32
    return %c0_i32, %c0_i32_0 : i32, i32
  }
  func.func @transform_4(%arg0: i32, %arg1: i32) -> (i32, i32) {
    %c0_i32 = arith.constant 0 : i32
    %c0_i32_0 = arith.constant 0 : i32
    %c0_i32_1 = arith.constant 0 : i32
    return %c0_i32, %c0_i32_0 : i32, i32
  }
  func.func @transform_5(%arg0: i32, %arg1: i32) -> (i32, i32) {
    %c0_i32 = arith.constant 0 : i32
    %c0_i32_0 = arith.constant 0 : i32
    %c0_i32_1 = arith.constant 0 : i32
    return %c0_i32, %c0_i32_0 : i32, i32
  }
  func.func @transform_6(%arg0: i32, %arg1: i32) -> (i32, i32) {
    %c0_i32 = arith.constant 0 : i32
    %c0_i32_0 = arith.constant 0 : i32
    %c0_i32_1 = arith.constant 0 : i32
    return %c0_i32, %c0_i32_0 : i32, i32
  }
  func.func @transform_7(%arg0: i32, %arg1: i32) -> (i32, i32, i32) {
    %c0_i32 = arith.constant 0 : i32
    %c0_i32_0 = arith.constant 0 : i32
    return %arg1, %arg0, %c0_i32 : i32, i32, i32
  }
  func.func @transform_8(%arg0: i32, %arg1: i32) -> (i32, i32, i32) {
    %c0_i32 = arith.constant 0 : i32
    %c0_i32_0 = arith.constant 0 : i32
    return %arg1, %arg0, %c0_i32 : i32, i32, i32
  }
  func.func @transform_9(%arg0: i32, %arg1: i32) -> (i32, i32, i32) {
    %c0_i32 = arith.constant 0 : i32
    %c0_i32_0 = arith.constant 0 : i32
    return %arg1, %arg0, %c0_i32 : i32, i32, i32
  }
}

</mosaic_0001>

<bundles_post_ra>
// kernel: tpu_custom_call.1
= control target key start
LH: loop header
LB: loop body
LE: loop exit
PB: predicated region body
PF: predicated region fallthrough
CT: control target
= control target key end

     0   :  { %15 = vsyncpa [#allocation4], 0  ;;  %s783_s0 = inlined_call_operand.hbm [shape: f32[8,16], index: 0, kind: input, shape index: {}]   ;;  %s784_s1 = inlined_call_operand.hbm [shape: f32[1,8,32], index: 1, kind: input, shape index: {}]   ;;  %s785_s2 = inlined_call_operand.hbm [shape: f32[1,8,16], index: 2, kind: input, shape index: {}]   ;;  %s786_s3 = inlined_call_operand.hbm [shape: f32[16,32], index: 3, kind: input, shape index: {}]   ;;  %s787_s4 = inlined_call_operand.vmem [shape: f32[1,32], index: 4, kind: input, shape index: {}]   ;;  %s788_s5 = inlined_call_operand.hbm [shape: f32[32,32], index: 5, kind: input, shape index: {}]   ;;  %s789_s6 = inlined_call_operand.vmem [shape: f32[1,32], index: 6, kind: input, shape index: {}]   ;;  %s790_s7 = inlined_call_operand.hbm [shape: f32[1,8,16], index: 7, kind: output, shape index: {0}]   ;;  %s791_s8 = inlined_call_operand.hbm [shape: f32[1,8,16], index: 8, kind: output, shape index: {1}]   ;;  %s792_s9 = inlined_call_operand.hbm [shape: f32[1,8,16], index: 9, kind: output, shape index: {2}]  }
   0x1   :  { %16 = vsyncpa [#allocation7], 0 }
   0x2   :  { %17 = vsyncpa [#allocation10], 0 }
   0x3   :  { %18 = vsyncpa [#allocation5], 0 }
   0x4   :  { %19 = vsyncpa [#allocation14], 0  ;;  %s591_s30 = smov [#allocation6]   ;;  %s592_s11 = smov [#allocation9]  }
   0x5   :  { %s36_s10 = sshll.u32 %s591_s30, 4  ;;  %s55_s12 = sshll.u32 %s592_s11, 4  ;;  %s37_s10 = int_to_ptr.vmem [resolvable:$true] %s36_s10  ;;  %s655_s12 = int_to_ptr.vmem [resolvable:$true] %s55_s12 }
   0x6   :  { %s405_s15 = scalar_lea.hbm %s784_s1, 128 }
   0x7   :  { %p406_p0 = scmp.ne.s32.totalorder %s784_s1, %s405_s15  ;;  %p409_p1 = scmp.lt.u32.totalorder %s405_s15, %s784_s1 }
   0x9   :  { %p411_p2 = pnand %p409_p1, %p406_p0 }
   0xb   :  { %414 = shalt.err (!%p411_p2)
}
   0xc   :  { %s415_s20 = scalar_lea.vmem %s37_s10, 128  ;;  %p420_p4 = scmp.lt.s32.totalorder %s37_s10, %s37_s10 }
   0xd   :  { %p416_p3 = scmp.ne.s32.totalorder %s37_s10, %s415_s20  ;;  %p421_p5 = scmp.lt.s32.totalorder %s415_s20, %s415_s20 }
   0xf   :  { %p422_p6 = por %p421_p5, %p420_p4 }
  0x11   :  { %p423_p7 = pnand %p422_p6, %p416_p3 }
  0x13   :  { %426 = shalt.err (!%p423_p7)
}
  0x14   :  { %39 = dma.hbm_to_vmem [thread:$0]  %s784_s1, 128, %s37_s10, [#allocation7]  }
  0x15   :  { %s427_s25 = scalar_lea.hbm %s786_s3, 256 }
  0x16   :  { %p428_p8 = scmp.ne.s32.totalorder %s786_s3, %s427_s25  ;;  %p431_p9 = scmp.lt.u32.totalorder %s427_s25, %s786_s3 }
  0x18   :  { %p433_p10 = pnand %p431_p9, %p428_p8 }
  0x1a   :  { %436 = shalt.err (!%p433_p10)
}
  0x1b   :  { %s437_s30 = scalar_lea.vmem %s655_s12, 256  ;;  %p442_p12 = scmp.lt.s32.totalorder %s655_s12, %s655_s12 }
  0x1c   :  { %p438_p11 = scmp.ne.s32.totalorder %s655_s12, %s437_s30  ;;  %p443_p13 = scmp.lt.s32.totalorder %s437_s30, %s437_s30 }
  0x1e   :  { %p444_p0 = por %p443_p13, %p442_p12 }
  0x20   :  { %p445_p1 = pnand %p444_p0, %p438_p11 }
  0x22   :  { %448 = shalt.err (!%p445_p1)
}
  0x23   :  { %s593_s1 = smov 128   ;;  %s594_s10 = smov 8  }
  0x24   :  { %61 = dma.hbm_to_vmem [thread:$0]  %s786_s3, 256, %s655_s12, [#allocation10], %s593_s1, %s593_s1, %s594_s10  }
  0x25   :  { %s595_s14 = smov [#allocation3]   ;;  %s596_s16 = smov [#allocation8]  }
  0x26   :  { %s26_s15 = sshll.u32 %s595_s14, 4  ;;  %s46_s17 = sshll.u32 %s596_s16, 4  ;;  %s27_s15 = int_to_ptr.vmem [resolvable:$true] %s26_s15  ;;  %s47_s17 = int_to_ptr.vmem [resolvable:$true] %s46_s17 }
  0x27   :  { %s449_s20 = scalar_lea.hbm %s783_s0, 128 }
  0x28   :  { %p450_p2 = scmp.ne.s32.totalorder %s783_s0, %s449_s20  ;;  %p453_p3 = scmp.lt.u32.totalorder %s449_s20, %s783_s0 }
  0x2a   :  { %p455_p4 = pnand %p453_p3, %p450_p2 }
  0x2c   :  { %458 = shalt.err (!%p455_p4)
}
  0x2d   :  { %s459_s3 = scalar_lea.vmem %s27_s15, 128  ;;  %p464_p6 = scmp.lt.s32.totalorder %s27_s15, %s27_s15 }
  0x2e   :  { %p460_p5 = scmp.ne.s32.totalorder %s27_s15, %s459_s3  ;;  %p465_p7 = scmp.lt.s32.totalorder %s459_s3, %s459_s3 }
  0x30   :  { %p466_p8 = por %p465_p7, %p464_p6 }
  0x32   :  { %p467_p9 = pnand %p466_p8, %p460_p5 }
  0x34   :  { %470 = shalt.err (!%p467_p9)
}
  0x35   :  { %29 = dma.hbm_to_vmem [thread:$0]  %s783_s0, 128, %s27_s15, [#allocation4]  }
  0x36   :  { %s471_s28 = scalar_lea.hbm %s785_s2, 128 }
  0x37   :  { %p472_p10 = scmp.ne.s32.totalorder %s785_s2, %s471_s28  ;;  %p475_p11 = scmp.lt.u32.totalorder %s471_s28, %s785_s2 }
  0x39   :  { %p477_p12 = pnand %p475_p11, %p472_p10 }
  0x3b   :  { %480 = shalt.err (!%p477_p12)
}
  0x3c   :  { %s481_s14 = scalar_lea.vmem %s47_s17, 128  ;;  %p486_p0 = scmp.lt.s32.totalorder %s47_s17, %s47_s17 }
  0x3d   :  { %p482_p13 = scmp.ne.s32.totalorder %s47_s17, %s481_s14  ;;  %p487_p1 = scmp.lt.s32.totalorder %s481_s14, %s481_s14 }
  0x3f   :  { %p488_p2 = por %p487_p1, %p486_p0 }
  0x41   :  { %p489_p3 = pnand %p488_p2, %p482_p13 }
  0x43   :  { %492 = shalt.err (!%p489_p3)
}
  0x44   :  { %49 = dma.hbm_to_vmem [thread:$0]  %s785_s2, 128, %s47_s17, [#allocation7]  }
  0x45   :  { %s597_s16 = smov [#allocation11]   ;;  %s493_s21 = scalar_lea.hbm %s788_s5, 512 }
  0x46   :  { %s69_s18 = sshll.u32 %s597_s16, 4  ;;  %p494_p4 = scmp.ne.s32.totalorder %s788_s5, %s493_s21  ;;  %s70_s18 = int_to_ptr.vmem [resolvable:$true] %s69_s18 }
  0x47   :  { %p497_p5 = scmp.lt.u32.totalorder %s493_s21, %s788_s5 }
  0x49   :  { %p499_p6 = pnand %p497_p5, %p494_p4 }
  0x4b   :  { %502 = shalt.err (!%p499_p6)
}
  0x4c   :  { %s503_s12 = scalar_lea.vmem %s70_s18, 512  ;;  %p508_p8 = scmp.lt.s32.totalorder %s70_s18, %s70_s18 }
  0x4d   :  { %p504_p7 = scmp.ne.s32.totalorder %s70_s18, %s503_s12  ;;  %p509_p9 = scmp.lt.s32.totalorder %s503_s12, %s503_s12 }
  0x4f   :  { %p510_p10 = por %p509_p9, %p508_p8 }
  0x51   :  { %p511_p11 = pnand %p510_p10, %p504_p7 }
  0x53   :  { %514 = shalt.err (!%p511_p11)
}
  0x54   :  { %75 = dma.hbm_to_vmem [thread:$0]  %s788_s5, 512, %s70_s18, [#allocation10], %s593_s1, %s593_s1, %s594_s10  }
  0x55   :  { %581 = dma.done.wait [#allocation4], 128  }
  0x56   :  { %582 = vsyncadd [#allocation4], 4294967168 }
  0x57   :  { %583 = dma.done.wait [#allocation7], 256  }
  0x58   :  { %584 = vsyncadd [#allocation7], 4294967040 }
  0x59   :  { %585 = dma.done.wait [#allocation10], 768  }
  0x5a   :  { %586 = vsyncadd [#allocation10], 4294966528  ;;  %v598_v0 = vmov 0.0|0.0   ;;  %vm599_vm0 = vmmov 0   ;;  %v600_v1 = vmov 0.0   ;;  %vm98_vm1 = vcmask 130048  }
  0x5b   :  { %376 = vmatprep.subr.bf16.mxu0 %v598_v0  ;;  %362 = vmatprep.mubr.msk.f32.mxu0 %vm599_vm0, %v600_v1  ;;  %v100_v2 = vld [vmem:[#allocation9] sm:$0xff]  ;;  %v101_v3 = vld [vmem:[#allocation9 + $0x8] sm:$0xff]  ;;  %v103_v7 = vld [vmem:[#allocation11] sm:$0xff]  ;;  %vm199_vm2 = vcmask 261120  }
  0x5c   :  { %379 = vmatprep.subr.bf16.mxu1 %v598_v0  ;;  %373 = vmatprep.mubr.msk.f32.mxu1 %vm599_vm0, %v600_v1  ;;  %v97_v4 = vld [vmem:[#allocation3] sm:$0xff]  ;;  %v377_v5 = vpack.c.bf16 %v101_v3, %v100_v2  ;;  %v104_v8 = vld [vmem:[#allocation11 + $0x8] sm:$0xff]  ;;  %v105_v9 = vld [vmem:[#allocation11 + $0x10] sm:$0xff] }
  0x5d   :  { %99 = vst.msk [vmem:[#allocation2] sm:$0xff] %vm98_vm1, %v97_v4  ;;  %v380_v10 = vpack.c.bf16 %v104_v8, %v103_v7  ;;  %v106_v11 = vld [vmem:[#allocation11 + $0x18] sm:$0xff]  ;;  %v346_v13 = vld [vmem:[%s787_s4] ss:$0 sm:$0xff]  ;;  %v109_v17 = vld [vmem:[#allocation6] sm:$0xff]  ;;  %s601_s4 = smov [#allocation13]  }
  0x5e   :  { %378 = vmatpush3.bf16.msra.mxu0 %v377_v5  ;;  %v383_v12 = vpack.c.bf16 %v106_v11, %v105_v9  ;;  %v348_v20 = vld [vmem:[%s789_s6] ss:$0 sm:$0xff]  ;;  %s318_s26 = sshll.u32 %s601_s4, 4  ;;  %s319_s26 = int_to_ptr.vmem [resolvable:$true] %s318_s26 }
  0x5f   :  { %381 = vmatpush3.bf16.msra.mxu1 %v380_v10  ;;  %s515_s27 = scalar_lea.vmem %s319_s26, 128  ;;  %p520_p13 = scmp.lt.s32.totalorder %s319_s26, %s319_s26 }
  0x60   :  { %382 = vmatprep.subr.bf16.mxu1 %v598_v0  ;;  %p516_p12 = scmp.ne.s32.totalorder %s319_s26, %s515_s27  ;;  %p521_p0 = scmp.lt.s32.totalorder %s515_s27, %s515_s27 }
  0x62   :  { %p522_p1 = por %p521_p0, %p520_p13 }
  0x63   :  { %384 = vmatpush3.bf16.msra.mxu1 %v383_v12 }
  0x64   :  { %v108_v6 = vld [vmem:[#allocation2] sm:$0xff]  ;;  %p523_p2 = pnand %p522_p1, %p516_p12 }
  0x65   :  { %363 = vmatmul.mubr.msk.f32.vlgmr.msra.gmra.mrb[0].mxu0 %vm98_vm1, %v108_v6 }
 0x138   :  { %v187_v14 = vpop.f32.mrb[0].mxu0 }
 0x139   :  { %v188_v15 = vadd.f32 %v346_v13, %v187_v14  ;;  %v364_v16 = vpop.f32.mrb[1].mxu0 }
 0x13b   :  { %399 = vtanh.f32 %v188_v15 }
 0x145   :  { %v400_v18 = vpop.eup %399 }
 0x146   :  { %v192_v19 = vadd.f32 %v400_v18, %v109_v17 }
 0x148   :  { %374 = vmatmul.mubr.msk.f32.vlgmr.msra.gmra.mrb[0].mxu1 %vm199_vm2, %v192_v19 }
 0x21b   :  { %v269_v21 = vpop.f32.mrb[0].mxu1 }
 0x21c   :  { %v270_v22 = vadd.f32 %v348_v20, %v269_v21  ;;  %v375_v23 = vpop.f32.mrb[1].mxu1 }
 0x21e   :  { %v274_v24 = vand.u32 2147483647, %v270_v22  ;;  %295 = vst.msk [vmem:[#allocation13] sm:$0xff] %vm98_vm1, %v270_v22 }
 0x220   :  { %v275_v25 = vsub.f32 0.0, %v274_v24 }
 0x222   :  { %v276_v26 = vmul.f32 1.442695, %v275_v25 }
 0x224   :  { %401 = vpow2.f32 %v276_v26 }
 0x22e   :  { %v402_v27 = vpop.eup %401 }
 0x22f   :  { %v278_v28 = vadd.f32 1.0, %v402_v27  ;;  %v281_v29 = vmul.f32 -0.5, %v402_v27 }
 0x231   :  { %403 = vlog2.f32 %v278_v28  ;;  %v282_v30 = vadd.f32 1.0, %v281_v29 }
 0x232   :  { %526 = shalt.err (!%p523_p2)
}
 0x233   :  { %s527_s29 = scalar_lea.hbm %s791_s8, 128 }
 0x234   :  { %p528_p3 = scmp.ne.s32.totalorder %s791_s8, %s527_s29  ;;  %p531_p4 = scmp.lt.u32.totalorder %s527_s29, %s791_s8 }
 0x236   :  { %p533_p5 = pnand %p531_p4, %p528_p3 }
 0x238   :  { %536 = shalt.err (!%p533_p5)
}
 0x239   :  { %321 = dma.vmem_to_hbm [thread:$0]  %s319_s26, 128, %s791_s8, [#allocation14]   ;;  %v284_v31 = vand.u32 2147483647, %v402_v27  ;;  %v283_v34 = vmul.f32 %v402_v27, %v282_v30  ;;  %v273_v35 = vmax.f32 %v270_v22, 0.0  ;;  %v110_v38 = vld [vmem:[#allocation8] sm:$0xff] }
 0x23a   :  { %s602_s16 = smov 112   ;;  %s603_s18 = smov [#allocation12]  }
 0x23b   :  { %v404_v32 = vpop.eup %403  ;;  %vm285_vm3 = vcmp.lt.f32.partialorder %v284_v31, 0.0004427343  ;;  %s308_s19 = sshll.u32 %s603_s18, 4  ;;  %s604_s20 = smov [#allocation15]   ;;  %s309_s19 = int_to_ptr.vmem [resolvable:$true] %s308_s19 }
 0x23c   :  { %v280_v33 = vmul.f32 0.6931472, %v404_v32  ;;  %s328_s21 = sshll.u32 %s604_s20, 4  ;;  %s537_s8 = scalar_lea.vmem %s309_s19, 128  ;;  %s749_s21 = int_to_ptr.vmem [resolvable:$true] %s328_s21 }
 0x23d   :  { %p538_p6 = scmp.ne.s32.totalorder %s309_s19, %s537_s8  ;;  %p542_p7 = scmp.lt.s32.totalorder %s309_s19, %s309_s19 }
 0x23e   :  { %v286_v36 = vsel %vm285_vm3, %v283_v34, %v280_v33  ;;  %p543_p8 = scmp.lt.s32.totalorder %s537_s8, %s537_s8 }
 0x23f   :  { %v287_v37 = vadd.f32 %v286_v36, %v273_v35 }
 0x240   :  { %p544_p9 = por %p543_p8, %p542_p7 }
 0x241   :  { %289 = vrot.lane.b32.xlu0 %v287_v37, %s602_s16 }
 0x242   :  { %p545_p10 = pnand %p544_p9, %p538_p6 }
 0x245   :  { %297 = vrot.lane.b32.xlu0 %v270_v22, %s602_s16 }
 0x2b3   :  { %v290_v39 = vpop.permute.xlu0 %289 }
 0x2b4   :  { %v292_v40 = vmul.f32 %v290_v39, %v110_v38 }
 0x2b6   :  { %v293_v41 = vadd.f32 %v292_v40, %v270_v22 }
 0x2b7   :  { %v298_v42 = vpop.permute.xlu0 %297 }
 0x2b8   :  { %301 = vst.msk [vmem:[#allocation2] sm:$0xff] %vm98_vm1, %v293_v41  ;;  %294 = vst.msk [vmem:[#allocation12] sm:$0xff] %vm98_vm1, %v293_v41 }
 0x2b9   :  { %300 = vst.msk [vmem:[#allocation15] sm:$0xff] %vm98_vm1, %v298_v42 }
 0x2ba   :  { %548 = shalt.err (!%p545_p10)
}
 0x2bb   :  { %s549_s24 = scalar_lea.hbm %s790_s7, 128 }
 0x2bc   :  { %p550_p11 = scmp.ne.s32.totalorder %s790_s7, %s549_s24  ;;  %p553_p12 = scmp.lt.u32.totalorder %s549_s24, %s790_s7 }
 0x2be   :  { %p555_p13 = pnand %p553_p12, %p550_p11 }
 0x2c0   :  { %558 = shalt.err (!%p555_p13)
}
 0x2c1   :  { %311 = dma.vmem_to_hbm [thread:$0]  %s309_s19, 128, %s790_s7, [#allocation5]  }
 0x2c2   :  { %s559_s10 = scalar_lea.vmem %s749_s21, 128  ;;  %p564_p1 = scmp.lt.s32.totalorder %s749_s21, %s749_s21 }
 0x2c3   :  { %p560_p0 = scmp.ne.s32.totalorder %s749_s21, %s559_s10  ;;  %p565_p2 = scmp.lt.s32.totalorder %s559_s10, %s559_s10 }
 0x2c5   :  { %p566_p3 = por %p565_p2, %p564_p1 }
 0x2c7   :  { %p567_p4 = pnand %p566_p3, %p560_p0 }
 0x2c9   :  { %570 = shalt.err (!%p567_p4)
}
 0x2ca   :  { %s571_s26 = scalar_lea.hbm %s792_s9, 128 }
 0x2cb   :  { %p572_p5 = scmp.ne.s32.totalorder %s792_s9, %s571_s26  ;;  %p575_p6 = scmp.lt.u32.totalorder %s571_s26, %s792_s9 }
 0x2cd   :  { %p577_p7 = pnand %p575_p6, %p572_p5 }
 0x2cf   :  { %580 = shalt.err (!%p577_p7)
}
 0x2d0   :  { %331 = dma.vmem_to_hbm [thread:$0]  %s749_s21, 128, %s792_s9, [#allocation14]  }
 0x2d1   :  { %587 = dma.done.wait [#allocation5], 128  }
 0x2d2   :  { %588 = vsyncadd [#allocation5], 4294967168 }
 0x2d3   :  { %589 = dma.done.wait [#allocation14], 256  }
 0x2d4   :  { %590 = vsyncadd [#allocation14], 4294967040 }
 0x2d5   :  { %341 = vsyncpa [#allocation4], 1 }
 0x2d6   :  { %342 = vsyncpa [#allocation7], 1 }
 0x2d7   :  { %343 = vsyncpa [#allocation10], 1 }
 0x2d8   :  { %344 = vsyncpa [#allocation5], 1 }
 0x2d9   :  { %345 = vsyncpa [#allocation14], 1 }

</bundles_post_ra>
